<compile_context>
chip_gen: v6e
topology: v6e:2x2x1
jax: 0.10.0
libtpu: 0.0.40
codegen_flags: <defaults>
</compile_context>

<pallas_src>
import jax
import jax.numpy as jnp
from jax.experimental import pallas as pl
from jax.experimental.pallas import tpu as pltpu


def regressor_kernel(x_ref, w1_ref, b1_ref, wh_ref, bh_ref, out_ref):
    # x_ref: (TN, C, T*V).  The MaxPool2d window covers all of (T, V), so the
    # pool is a global max over the last (lane) axis.
    pooled = jnp.max(x_ref[...], axis=-1)                       # (TN, C)
    pooled = pooled.astype(w1_ref.dtype)

    # linear1 + ReLU.
    h = jnp.dot(pooled, w1_ref[...], preferred_element_type=jnp.float32)
    h = jnp.maximum(h + b1_ref[...], 0.0)                       # (TN, L) f32
    # TODO(synk): training-mode dropout (p=0.4) not implemented; inference identity.

    # Fused regression heads: column 0 = udprs_head, column 1 = best_head.
    out_ref[...] = (jnp.dot(h.astype(wh_ref.dtype), wh_ref[...],
                            preferred_element_type=jnp.float32)
                    + bh_ref[...]).astype(out_ref.dtype)


def _choose_batch_tile(N, C, TV, dtype):
    """Batch tile whose double-buffered x footprint stays well inside the
    smallest scoped-VMEM budget (v7x: 64 MiB physical)."""
    itemsize = jnp.dtype(dtype).itemsize
    lanes = ((TV + 127) // 128) * 128            # VMEM lane padding (136 -> 256)
    sublane = max(8, 32 // max(itemsize, 1))     # sub-32-bit dtypes pack sublanes
    rows = ((C + sublane - 1) // sublane) * sublane
    per_n_bytes = rows * lanes * itemsize
    budget = 8 * 1024 * 1024                     # per x buffer (x2 for double-buffer)
    tn = max(1, budget // per_n_bytes)
    if tn >= N:
        return N                                 # single block: no grid overhead
    tn = max((tn // 8) * 8, 8)                   # keep output block sublane-aligned
    return min(tn, N)


def regressor_forward(x, params, *, batch_tile=None):
    """x: (N, M, C, T, V) with M == 1. Returns (udprs_score, best_score), each (N, 1)."""
    N, M, C, T, V = x.shape
    assert M == 1, "reshape(N, C, T, V) in the reference requires M == 1"
    TV = T * V
    x3 = x.reshape(N, C, TV)                     # native dtype; no wrapper-side cast

    w1, b1 = params["w1"], params["b1"]
    L = w1.shape[1]
    # Fuse the two heads into one (L, 2) matmul; fold their biases in as well.
    wh = jnp.concatenate([params["wu"], params["wb"]], axis=1)      # (L, 2)
    bh = jnp.concatenate([params["bu"], params["bb"]], axis=1)      # (1, 2)

    tn = batch_tile if batch_tile is not None else _choose_batch_tile(N, C, TV, x3.dtype)
    assert tn == N or tn % 8 == 0, "batch tile must equal N or be a multiple of 8"
    grid = (pl.cdiv(N, tn),)

    itemsize = jnp.dtype(x3.dtype).itemsize
    cost = pl.CostEstimate(
        flops=2 * N * C * L + 2 * N * L * 2 + N * L,
        transcendentals=0,
        bytes_accessed=(N * C * TV * itemsize
                        + (C * L + L + 2 * L + 2) * 4
                        + N * 2 * 4),
    )

    out = pl.pallas_call(
        regressor_kernel,
        out_shape=jax.ShapeDtypeStruct((N, 2), jnp.float32),
        grid=grid,
        in_specs=[
            pl.BlockSpec((tn, C, TV), lambda i: (i, 0, 0)),   # x tile (pipelined)
            pl.BlockSpec((C, L), lambda i: (0, 0)),           # weights stay resident
            pl.BlockSpec((1, L), lambda i: (0, 0)),
            pl.BlockSpec((L, 2), lambda i: (0, 0)),
            pl.BlockSpec((1, 2), lambda i: (0, 0)),
        ],
        out_specs=pl.BlockSpec((tn, 2), lambda i: (i, 0)),
        compiler_params=pltpu.CompilerParams(
            dimension_semantics=("parallel",),                # shard over v7x's 2 TCs
            vmem_limit_bytes=64 * 1024 * 1024,
        ),
        cost_estimate=cost,
    )(x3, w1, b1, wh, bh)

    return out[:, 0:1], out[:, 1:2]


def init_params(key, in_channels, latent_dim, init_std=0.01):
    """Synthetic init mirroring normal_init(std=init_std, bias=0).

    PyTorch Linear stores weight as (out, in); we generate in that shape and
    transpose so the kernel does x @ W^T + b.
    """
    k1, k2, k3 = jax.random.split(key, 3)
    w1 = jax.random.normal(k1, (latent_dim, in_channels), jnp.float32) * init_std
    wu = jax.random.normal(k2, (1, latent_dim), jnp.float32) * init_std
    wb = jax.random.normal(k3, (1, latent_dim), jnp.float32) * init_std
    return {
        "w1": w1.T,                                   # (C, L)
        "b1": jnp.zeros((1, latent_dim), jnp.float32),
        "wu": wu.T,                                   # (L, 1)
        "bu": jnp.zeros((1, 1), jnp.float32),
        "wb": wb.T,                                   # (L, 1)
        "bb": jnp.zeros((1, 1), jnp.float32),
    }


def _reference(x, params):
    N, M, C, T, V = x.shape
    pooled = jnp.max(x.reshape(N, C, T * V), axis=-1)
    h = jnp.maximum(pooled @ params["w1"] + params["b1"], 0.0)
    return h @ params["wu"] + params["bu"], h @ params["wb"] + params["bb"]


if __name__ == "__main__":
    # Small shapes consistent with the module: pool kernel = (compressed_T_dim, 17)
    N, M = 2, 1
    in_channels = 16
    latent_dim = 32
    compressed_T_dim = 8
    T, V = compressed_T_dim, 17

    key = jax.random.PRNGKey(0)
    kx, kp, kx2 = jax.random.split(key, 3)
    x = jax.random.normal(kx, (N, M, in_channels, T, V), jnp.float32)
    params = init_params(kp, in_channels, latent_dim)

    # Single-block path (tiny N): whole batch in one tile.
    udprs_score, best_score = regressor_forward(x, params)
    jax.block_until_ready((udprs_score, best_score))
    u_ref, b_ref = _reference(x, params)
    assert udprs_score.shape == (N, 1) and best_score.shape == (N, 1)
    assert jnp.allclose(udprs_score, u_ref, atol=1e-5)
    assert jnp.allclose(best_score, b_ref, atol=1e-5)

    # Tiled / grid path (forced small batch tile to exercise pipelining).
    N2 = 16
    x2 = jax.random.normal(kx2, (N2, M, in_channels, T, V), jnp.float32)
    u2, b2 = regressor_forward(x2, params, batch_tile=8)
    jax.block_until_ready((u2, b2))
    u2_ref, b2_ref = _reference(x2, params)
    assert jnp.allclose(u2, u2_ref, atol=1e-5)
    assert jnp.allclose(b2, b2_ref, atol=1e-5)

    print("KERNEL_OK")
</pallas_src>

<mosaic_0001>
module attributes {stable_mosaic.version = 11 : i64} {
  func.func @regressor_kernel(%arg0: i32, %arg1: memref<2x16x136xf32, #tpu.memory_space<vmem>>, %arg2: memref<16x32xf32, #tpu.memory_space<vmem>>, %arg3: memref<1x32xf32, #tpu.memory_space<vmem>>, %arg4: memref<32x2xf32, #tpu.memory_space<vmem>>, %arg5: memref<1x2xf32, #tpu.memory_space<vmem>>, %arg6: memref<2x2xf32, #tpu.memory_space<vmem>>) attributes {dimension_semantics = [#tpu.dimension_semantics<parallel>], iteration_bounds = array<i64: 1>, scalar_prefetch = 0 : i64, scratch_operands = 0 : i64, tpu.core_type = #tpu.core_type<tc>, window_params = [{transform_indices = @transform_0, window_bounds = array<i64: 2, 16, 136>}, {pipeline_mode = #tpu.pipeline_mode<synchronous>, transform_indices = @transform_1, window_bounds = array<i64: 16, 32>}, {pipeline_mode = #tpu.pipeline_mode<synchronous>, transform_indices = @transform_2, window_bounds = array<i64: 1, 32>}, {pipeline_mode = #tpu.pipeline_mode<synchronous>, transform_indices = @transform_3, window_bounds = array<i64: 32, 2>}, {pipeline_mode = #tpu.pipeline_mode<synchronous>, transform_indices = @transform_4, window_bounds = array<i64: 1, 2>}, {transform_indices = @transform_5, window_bounds = array<i64: 2, 2>}]} {
    %c0 = arith.constant 0 : index
    %c0_0 = arith.constant 0 : index
    %c0_1 = arith.constant 0 : index
    %0 = vector.load %arg1[%c0, %c0_0, %c0_1] : memref<2x16x136xf32, #tpu.memory_space<vmem>>, vector<2x16x136xf32>
    %cst = arith.constant dense<0xFF800000> : vector<2x16xf32>
    %1 = vector.multi_reduction <maximumf>, %0, %cst [2] : vector<2x16x136xf32> to vector<2x16xf32>
    %c0_2 = arith.constant 0 : index
    %c0_3 = arith.constant 0 : index
    %2 = vector.load %arg2[%c0_2, %c0_3] : memref<16x32xf32, #tpu.memory_space<vmem>>, vector<16x32xf32>
    %cst_4 = arith.constant dense<0.000000e+00> : vector<2x32xf32>
    %3 = tpu.matmul %1, %2, %cst_4 {dimension_numbers = #tpu.dot_dimension_numbers<[1], [0], [0], [1], [0, 0, 1, 1], [], []>} : vector<2x16xf32>, vector<16x32xf32>, vector<2x32xf32> -> vector<2x32xf32>
    %c0_5 = arith.constant 0 : index
    %c0_6 = arith.constant 0 : index
    %4 = vector.load %arg3[%c0_5, %c0_6] : memref<1x32xf32, #tpu.memory_space<vmem>>, vector<1x32xf32>
    %5 = vector.broadcast %4 : vector<1x32xf32> to vector<2x32xf32>
    %6 = arith.addf %3, %5 : vector<2x32xf32>
    %cst_7 = arith.constant 0.000000e+00 : f32
    %7 = vector.broadcast %cst_7 : f32 to vector<2x32xf32>
    %8 = arith.maximumf %6, %7 : vector<2x32xf32>
    %c0_8 = arith.constant 0 : index
    %c0_9 = arith.constant 0 : index
    %9 = vector.load %arg4[%c0_8, %c0_9] : memref<32x2xf32, #tpu.memory_space<vmem>>, vector<32x2xf32>
    %cst_10 = arith.constant dense<0.000000e+00> : vector<2x2xf32>
    %10 = tpu.matmul %8, %9, %cst_10 {dimension_numbers = #tpu.dot_dimension_numbers<[1], [0], [0], [1], [0, 0, 1, 1], [], []>} : vector<2x32xf32>, vector<32x2xf32>, vector<2x2xf32> -> vector<2x2xf32>
    %c0_11 = arith.constant 0 : index
    %c0_12 = arith.constant 0 : index
    %11 = vector.load %arg5[%c0_11, %c0_12] : memref<1x2xf32, #tpu.memory_space<vmem>>, vector<1x2xf32>
    %12 = vector.broadcast %11 : vector<1x2xf32> to vector<2x2xf32>
    %13 = arith.addf %10, %12 : vector<2x2xf32>
    %c0_13 = arith.constant 0 : index
    %c0_14 = arith.constant 0 : index
    %14 = vector.load %arg6[%c0_13, %c0_14] : memref<2x2xf32, #tpu.memory_space<vmem>>, vector<2x2xf32>
    tpu.vector_store %arg6[%c0_13, %c0_14], %13 {strides = array<i32>} : memref<2x2xf32, #tpu.memory_space<vmem>>, vector<2x2xf32>,
    return
  }
  func.func @transform_0(%arg0: i32) -> (i32, i32, i32) {
    %c0_i32 = arith.constant 0 : i32
    %c0_i32_0 = arith.constant 0 : i32
    %c0_i32_1 = arith.constant 0 : i32
    return %arg0, %c0_i32, %c0_i32_0 : i32, i32, i32
  }
  func.func @transform_1(%arg0: i32) -> (i32, i32) {
    %c0_i32 = arith.constant 0 : i32
    %c0_i32_0 = arith.constant 0 : i32
    %c0_i32_1 = arith.constant 0 : i32
    return %c0_i32, %c0_i32_0 : i32, i32
  }
  func.func @transform_2(%arg0: i32) -> (i32, i32) {
    %c0_i32 = arith.constant 0 : i32
    %c0_i32_0 = arith.constant 0 : i32
    %c0_i32_1 = arith.constant 0 : i32
    return %c0_i32, %c0_i32_0 : i32, i32
  }
  func.func @transform_3(%arg0: i32) -> (i32, i32) {
    %c0_i32 = arith.constant 0 : i32
    %c0_i32_0 = arith.constant 0 : i32
    %c0_i32_1 = arith.constant 0 : i32
    return %c0_i32, %c0_i32_0 : i32, i32
  }
  func.func @transform_4(%arg0: i32) -> (i32, i32) {
    %c0_i32 = arith.constant 0 : i32
    %c0_i32_0 = arith.constant 0 : i32
    %c0_i32_1 = arith.constant 0 : i32
    return %c0_i32, %c0_i32_0 : i32, i32
  }
  func.func @transform_5(%arg0: i32) -> (i32, i32) {
    %c0_i32 = arith.constant 0 : i32
    %c0_i32_0 = arith.constant 0 : i32
    return %arg0, %c0_i32 : i32, i32
  }
}

</mosaic_0001>

<bundles_post_ra>
// kernel: tpu_custom_call.1
= control target key start
LH: loop header
LB: loop body
LE: loop exit
PB: predicated region body
PF: predicated region fallthrough
CT: control target
= control target key end

     0   :  { %10 = vsyncpa [#allocation3], 0  ;;  %s419_s0 = inlined_call_operand.hbm [shape: f32[2,16,136], index: 0, kind: input, shape index: {}]   ;;  %s420_s1 = inlined_call_operand.vmem [shape: f32[16,32], index: 1, kind: input, shape index: {}]   ;;  %s421_s2 = inlined_call_operand.vmem [shape: f32[1,32], index: 2, kind: input, shape index: {}]   ;;  %s422_s3 = inlined_call_operand.vmem [shape: f32[32,2], index: 3, kind: input, shape index: {}]   ;;  %s423_s4 = inlined_call_operand.vmem [shape: f32[1,2], index: 4, kind: input, shape index: {}]   ;;  %s424_s5 = inlined_call_operand.hbm [shape: f32[2,2], index: 5, kind: output, shape index: {}]  }
   0x1   :  { %11 = vsyncpa [#allocation4], 0  ;;  %s353_s18 = smov [#allocation2]  }
   0x2   :  { %s17_s19 = sshll.u32 %s353_s18, 4  ;;  %s18_s19 = int_to_ptr.vmem [resolvable:$true] %s17_s19 }
   0x3   :  { %s317_s20 = scalar_lea.vmem %s18_s19, 1024  ;;  %p322_p1 = scmp.lt.s32.totalorder %s18_s19, %s18_s19 }
   0x4   :  { %p318_p0 = scmp.ne.s32.totalorder %s18_s19, %s317_s20  ;;  %p323_p2 = scmp.lt.s32.totalorder %s317_s20, %s317_s20 }
   0x6   :  { %p324_p3 = por %p323_p2, %p322_p1 }
   0x8   :  { %p325_p4 = pnand %p324_p3, %p318_p0 }
   0xa   :  { %328 = shalt.err (!%p325_p4)
}
   0xb   :  { %s354_s21 = smov 256   ;;  %s355_s22 = smov 16  }
   0xc   :  { %23 = dma.hbm_to_vmem [thread:$0]  %s419_s0, 1024, %s18_s19, [#allocation3], %s354_s21, %s354_s21, %s355_s22  }
   0xd   :  { %349 = dma.done.wait [#allocation3], 1024  }
   0xe   :  { %350 = vsyncadd [#allocation3], 4294966272  ;;  %vm43_vm0 = vcmask 64512   ;;  %v39_v0 = vld [vmem:[#allocation2 + $0x20] sm:$0xff]  ;;  %v40_v1 = vld [vmem:[#allocation2 + $0x28] sm:$0xff]  ;;  %v356_v16 = vmov 0.0   ;;  %v73_v20 = vlaneseq }
   0xf   :  { %v35_v2 = vld [vmem:[#allocation2] sm:$0xff]  ;;  %v52_v3 = vsel %vm43_vm0, %v40_v1, -inf  ;;  %v36_v4 = vld [vmem:[#allocation2 + $0x8] sm:$0xff]  ;;  %v41_v5 = vld [vmem:[#allocation2 + $0x30] sm:$0xff]  ;;  %285 = vmatprep.subr.mxu0 %v356_v16  ;;  %292 = vmatprep.subr.mxu1 %v356_v16  ;;  %vm357_vm1 = vmmov 0   ;;  %vm84_vm2 = vcmask 130112  }
  0x10   :  { %v42_v6 = vld [vmem:[#allocation2 + $0x38] sm:$0xff]  ;;  %v53_v7 = vmax.f32 %v39_v0, %v52_v3  ;;  %v44_v8 = vsel %vm43_vm0, %v36_v4, -inf  ;;  %v37_v10 = vld [vmem:[#allocation2 + $0x10] sm:$0xff]  ;;  %v61_v17 = vld [vmem:[%s420_s1 + $0x8] sm:$0xff]  ;;  %289 = vmatprep.mubr.msk.f32.mxu0 %vm357_vm1, %v356_v16  ;;  %300 = vmatprep.mubr.msk.f32.mxu1 %vm357_vm1, %v356_v16  ;;  %v74_v21 = vand.u32 127, %v73_v20  ;;  %v76_v22 = vshrl.u32 %v73_v20, 7 }
  0x11   :  { %v56_v9 = vsel %vm43_vm0, %v42_v6, -inf  ;;  %v38_v11 = vld [vmem:[#allocation2 + $0x18] sm:$0xff]  ;;  %v45_v12 = vmax.f32 %v35_v2, %v44_v8  ;;  %286 = vmatpush3.msra.mxu0 %v61_v17  ;;  %v60_v18 = vld [vmem:[%s420_s1] sm:$0xff]  ;;  %vm95_vm3 = vcmask 1041409   ;;  %vm97_vm4 = vcmask 130048   ;;  %v173_v37 = vld [vmem:[%s422_s3 + $0x10] sm:$0xff] }
  0x12   :  { %v48_v13 = vsel %vm43_vm0, %v38_v11, -inf  ;;  %54 = vmax.xlane.f32.xlu1 %v53_v7  ;;  %v57_v14 = vmax.f32 %v41_v5, %v56_v9  ;;  %287 = vmatprep.subr.mxu0 %v356_v16  ;;  %v174_v19 = vld [vmem:[%s422_s3 + $0x18] sm:$0xff]  ;;  %v79_v23 = vadd.s32 4294967288, %v74_v21  ;;  %v77_v25 = vsub.s32 %v74_v21, %v76_v22  ;;  %v172_v38 = vld [vmem:[%s422_s3 + $0x8] sm:$0xff]  ;;  %v171_v39 = vld [vmem:[%s422_s3] sm:$0xff]  ;;  %s358_s14 = smov [#allocation5]  }
  0x13   :  { %46 = vmax.xlane.f32.xlu0 %v45_v12  ;;  %v49_v15 = vmax.f32 %v37_v10, %v48_v13  ;;  %288 = vmatpush3.msra.mxu0 %v60_v18  ;;  %v273_v40 = vld [vmem:[%s421_s2] ss:$0 sm:$0xff]  ;;  %vm182_vm5 = vcmask 261120   ;;  %s264_s15 = sshll.u32 %s358_s14, 4  ;;  %vm256_vm6 = vcmask 9216   ;;  %s265_s15 = int_to_ptr.vmem [resolvable:$true] %s264_s15 }
  0x14   :  { %293 = vmatpush3.msra.mxu1 %v174_v19  ;;  %v82_v27 = vsub.s32 %v79_v23, %v76_v22  ;;  %v275_v45 = vld [vmem:[%s423_s4] ss:$0 sm:$0xff]  ;;  %s329_s3 = scalar_lea.vmem %s265_s15, 32  ;;  %p334_p6 = scmp.lt.s32.totalorder %s265_s15, %s265_s15 }
  0x15   :  { %294 = vmatprep.subr.mxu1 %v356_v16  ;;  %p330_p5 = scmp.ne.s32.totalorder %s265_s15, %s329_s3  ;;  %p335_p7 = scmp.lt.s32.totalorder %s329_s3, %s329_s3 }
  0x16   :  { %58 = vmax.xlane.f32.xlu1 %v57_v14  ;;  %295 = vmatpush3.msra.mxu1 %v173_v37 }
  0x17   :  { %50 = vmax.xlane.f32.xlu0 %v49_v15  ;;  %296 = vmatprep.subr.mxu1 %v356_v16  ;;  %p336_p8 = por %p335_p7, %p334_p6 }
  0x18   :  { %297 = vmatpush3.msra.mxu1 %v172_v38 }
  0x19   :  { %298 = vmatprep.subr.mxu1 %v356_v16  ;;  %p337_p9 = pnand %p336_p8, %p330_p5 }
  0x1a   :  { %299 = vmatpush3.msra.mxu1 %v171_v39 }
  0x9b   :  { %v55_v24 = vpop.xlane.xlu1 %54 }
  0x9c   :  { %v47_v26 = vpop.xlane.xlu0 %46  ;;  %v89_v29 = vrot.slane %v55_v24, %v77_v25 }
  0x9d   :  { %v78_v32 = vrot.slane %v47_v26, %v77_v25 }
  0x9f   :  { %v59_v28 = vpop.xlane.xlu1 %58 }
  0xa0   :  { %v93_v30 = vrot.slane %v59_v28, %v82_v27  ;;  %v51_v31 = vpop.xlane.xlu0 %50 }
  0xa1   :  { %v83_v33 = vrot.slane %v51_v31, %v82_v27 }
  0xa2   :  { %v94_v34 = vsel %vm84_vm2, %v93_v30, %v89_v29 }
  0xa3   :  { %v85_v35 = vsel %vm84_vm2, %v83_v33, %v78_v32 }
  0xa4   :  { %v96_v36 = vsel %vm95_vm3, %v94_v34, %v85_v35 }
  0xa5   :  { %290 = vmatmul.mubr.msk.f32.vlgmr.msra.gmra.mxu0 %vm97_vm4, %v96_v36 }
 0x165   :  { %v166_v41 = vpop.f32.mrf.mxu0 }
 0x166   :  { %v167_v42 = vadd.f32 %v273_v40, %v166_v41 }
 0x167   :  { %v291_v43 = vpop.f32.mrf.mxu0 }
 0x168   :  { %v170_v44 = vmax.f32 %v167_v42, 0.0 }
 0x16a   :  { %301 = vmatmul.mubr.msk.f32.vlgmr.msra.gmra.mxu1 %vm182_vm5, %v170_v44 }
 0x22a   :  { %v252_v46 = vpop.f32.mrf.mxu1 }
 0x22b   :  { %v253_v47 = vadd.f32 %v275_v45, %v252_v46 }
 0x22c   :  { %v302_v48 = vpop.f32.mrf.mxu1 }
 0x22d   :  { %257 = vst.msk [vmem:[#allocation5] sm:$0x3] %vm256_vm6, %v253_v47 }
 0x22e   :  { %340 = shalt.err (!%p337_p9)
}
 0x22f   :  { %267 = dma.vmem_to_hbm [thread:$0]  %s265_s15, 32, %s424_s5, [#allocation4]  }
 0x230   :  { %351 = dma.done.wait [#allocation4], 32  }
 0x231   :  { %352 = vsyncadd [#allocation4], 4294967264 }
 0x232   :  { %271 = vsyncpa [#allocation3], 1 }
 0x233   :  { %272 = vsyncpa [#allocation4], 1 }

</bundles_post_ra>
